<compile_context>
chip_gen: v6e
topology: v6e:2x2x1
jax: 0.10.0
libtpu: 0.0.40
codegen_flags: <defaults>
</compile_context>

<pallas_src>
import functools

import jax
import jax.numpy as jnp
from jax import lax
from jax.experimental import pallas as pl
from jax.experimental.pallas import tpu as pltpu


def _round_up(x, m):
    return ((x + m - 1) // m) * m


# ---------------------------------------------------------------------------
# Conv2dWrapper forward: fused im2col + lane-dense transposed matmul kernel
# ---------------------------------------------------------------------------
def conv2d_wrapper_forward(x, weight, bias, *, stride, padding):
    """x: (N, Cin, H, W); weight: (Cout, Cin, KH, KW); bias: (Cout,). Returns NCHW."""
    N, Cin, H, W = x.shape
    Cout, _, KH, KW = weight.shape
    sh, sw = (stride, stride) if isinstance(stride, int) else stride
    ph, pw = (padding, padding) if isinstance(padding, int) else padding

    Hp, Wp = H + 2 * ph, W + 2 * pw
    OHd, OWd = Hp - KH + 1, Wp - KW + 1          # dense (stride-1) output extent
    OH = (H + 2 * ph - KH) // sh + 1
    OW = (W + 2 * pw - KW) // sw + 1
    K = Cin * KH * KW

    max_shift = (KH - 1) * Wp + (KW - 1)
    LT = _round_up(OHd * Wp, 128)                # lane-dense output length per image
    LIN = _round_up(LT + max_shift, 128)         # flat padded-input length per image

    # --- tiny layout plumbing in XLA: pad, flatten spatial, cast to bf16 ---
    xp = jnp.pad(x, ((0, 0), (0, 0), (ph, ph), (pw, pw)))          # (N, Cin, Hp, Wp)
    xf = xp.reshape(N, Cin, Hp * Wp)
    xf = jnp.pad(xf, ((0, 0), (0, 0), (0, LIN - Hp * Wp)))
    xf = xf.astype(jnp.bfloat16)                                   # MXU input dtype

    # Weight rows ordered (kh, kw, cin) to match the in-kernel patch build order.
    w_r = weight.transpose(0, 2, 3, 1).reshape(Cout, K).astype(jnp.bfloat16)
    b2 = bias.reshape(Cout, 1).astype(jnp.float32)

    shifts = tuple(kh * Wp + kw for kh in range(KH) for kw in range(KW))

    def kernel(x_ref, w_ref, b_ref, o_ref):
        # x_ref: (Cin, LIN) bf16  -- whole padded image (flat), resident in VMEM
        # w_ref: (Cout, K)  bf16  -- flattened conv weight, (kh, kw, cin) order
        # b_ref: (Cout, 1)  f32
        # o_ref: (Cout, LT) f32   -- lane-dense transposed output tile
        xv = x_ref[...]
        # Fused im2col: each (kh, kw) patch row is a constant flat shift.
        p_t = jnp.concatenate([xv[:, s:s + LT] for s in shifts], axis=0)     # (K, LT)
        acc = jnp.dot(w_ref[...], p_t, preferred_element_type=jnp.float32)   # (Cout, LT)
        o_ref[...] = (acc + b_ref[...]).astype(o_ref.dtype)                  # f32 epilogue

    out_full = pl.pallas_call(
        kernel,
        out_shape=jax.ShapeDtypeStruct((N, Cout, LT), jnp.float32),
        grid_spec=pltpu.PrefetchScalarGridSpec(
            num_scalar_prefetch=0,
            grid=(N,),                                        # one image per grid step
            in_specs=[
                pl.BlockSpec((None, Cin, LIN), lambda n: (n, 0, 0)),   # this image
                pl.BlockSpec((Cout, K), lambda n: (0, 0)),             # resident weight
                pl.BlockSpec((Cout, 1), lambda n: (0, 0)),             # resident bias
            ],
            out_specs=pl.BlockSpec((None, Cout, LT), lambda n: (n, 0, 0)),
        ),
        compiler_params=pltpu.CompilerParams(
            dimension_semantics=("parallel",),                # v7x: 2 TCs, 1 image each
        ),
    )(xf, w_r, b2)

    # Dense flat positions -> NCHW: reshape + column crop (+ stride subsample).
    out = out_full[:, :, :OHd * Wp].reshape(N, Cout, OHd, Wp)[:, :, :, :OWd]
    out = out[:, :, ::sh, ::sw][:, :, :OH, :OW]
    return out


# ---------------------------------------------------------------------------
# Deterministic parameter init (mirrors Conv2dWrapper(weight_init='fanin'))
# ---------------------------------------------------------------------------
def init_params(key, in_channels, out_channels, kernel_size):
    kw_, kb_ = jax.random.split(key)
    KH = KW = kernel_size
    # fanin_init(size): fanin = size[0] = out_channels ; U(-1/sqrt(fanin), 1/sqrt(fanin))
    v = 1.0 / jnp.sqrt(jnp.float32(out_channels))
    weight = jax.random.uniform(
        kw_, (out_channels, in_channels, KH, KW), jnp.float32, minval=-v, maxval=v)
    # nn.Conv2d default bias init: U(-1/sqrt(fan_in), 1/sqrt(fan_in)), fan_in = Cin*KH*KW
    vb = 1.0 / jnp.sqrt(jnp.float32(in_channels * KH * KW))
    bias = jax.random.uniform(
        kb_, (out_channels,), jnp.float32, minval=-vb, maxval=vb)
    return weight, bias


if __name__ == "__main__":
    # Module config: Conv2dWrapper(in_channels=4, out_channels=8, kernel_size=3,
    #                              stride=1, padding=1, weight_init='fanin')
    in_channels, out_channels, kernel_size, stride, padding = 4, 8, 3, 1, 1

    key = jax.random.PRNGKey(0)
    k_x, k_p = jax.random.split(key)

    x = jax.random.normal(k_x, (2, in_channels, 16, 16), jnp.float32)  # NCHW
    weight, bias = init_params(k_p, in_channels, out_channels, kernel_size)

    fwd = jax.jit(functools.partial(conv2d_wrapper_forward, stride=stride, padding=padding))
    y = jax.block_until_ready(fwd(x, weight, bias))

    # Sanity-check against XLA's conv (same NCHW / OIHW semantics as torch Conv2d).
    y_ref = lax.conv_general_dilated(
        x, weight, window_strides=(stride, stride),
        padding=((padding, padding), (padding, padding)),
        dimension_numbers=("NCHW", "OIHW", "NCHW"),
    ) + bias.reshape(1, -1, 1, 1)

    assert y.shape == (2, out_channels, 16, 16)
    # bf16 MXU inputs (f32 accumulate) -> loosened tolerance vs the pure-f32 reference.
    assert jnp.max(jnp.abs(y - y_ref)) < 5e-2

    print("KERNEL_OK")
</pallas_src>

<mosaic_0001>
module attributes {stable_mosaic.version = 11 : i64} {
  func.func @kernel(%arg0: i32, %arg1: memref<1x4x512xbf16, #tpu.memory_space<vmem>>, %arg2: memref<8x36xbf16, #tpu.memory_space<vmem>>, %arg3: memref<8x1xf32, #tpu.memory_space<vmem>>, %arg4: memref<1x8x384xf32, #tpu.memory_space<vmem>>) attributes {dimension_semantics = [#tpu.dimension_semantics<parallel>], iteration_bounds = array<i64: 2>, scalar_prefetch = 0 : i64, scratch_operands = 0 : i64, tpu.core_type = #tpu.core_type<tc>, window_params = [{transform_indices = @transform_0, window_bounds = array<i64: 1, 4, 512>}, {pipeline_mode = #tpu.pipeline_mode<synchronous>, transform_indices = @transform_1, window_bounds = array<i64: 8, 36>}, {pipeline_mode = #tpu.pipeline_mode<synchronous>, transform_indices = @transform_2, window_bounds = array<i64: 8, 1>}, {transform_indices = @transform_3, window_bounds = array<i64: 1, 8, 384>}]} {
    %c0 = arith.constant 0 : index
    %c0_0 = arith.constant 0 : index
    %c0_1 = arith.constant 0 : index
    %0 = vector.load %arg1[%c0, %c0_0, %c0_1] : memref<1x4x512xbf16, #tpu.memory_space<vmem>>, vector<1x4x512xbf16>
    %1 = vector.shape_cast %0 : vector<1x4x512xbf16> to vector<4x512xbf16>
    %2 = vector.extract_strided_slice %1 {offsets = [0, 0], sizes = [4, 384], strides = [1, 1]} : vector<4x512xbf16> to vector<4x384xbf16>
    %3 = vector.extract_strided_slice %1 {offsets = [0, 1], sizes = [4, 384], strides = [1, 1]} : vector<4x512xbf16> to vector<4x384xbf16>
    %4 = vector.extract_strided_slice %1 {offsets = [0, 2], sizes = [4, 384], strides = [1, 1]} : vector<4x512xbf16> to vector<4x384xbf16>
    %5 = vector.extract_strided_slice %1 {offsets = [0, 18], sizes = [4, 384], strides = [1, 1]} : vector<4x512xbf16> to vector<4x384xbf16>
    %6 = vector.extract_strided_slice %1 {offsets = [0, 19], sizes = [4, 384], strides = [1, 1]} : vector<4x512xbf16> to vector<4x384xbf16>
    %7 = vector.extract_strided_slice %1 {offsets = [0, 20], sizes = [4, 384], strides = [1, 1]} : vector<4x512xbf16> to vector<4x384xbf16>
    %8 = vector.extract_strided_slice %1 {offsets = [0, 36], sizes = [4, 384], strides = [1, 1]} : vector<4x512xbf16> to vector<4x384xbf16>
    %9 = vector.extract_strided_slice %1 {offsets = [0, 37], sizes = [4, 384], strides = [1, 1]} : vector<4x512xbf16> to vector<4x384xbf16>
    %10 = vector.extract_strided_slice %1 {offsets = [0, 38], sizes = [4, 384], strides = [1, 1]} : vector<4x512xbf16> to vector<4x384xbf16>
    %11 = tpu.concatenate %2, %3, %4, %5, %6, %7, %8, %9, %10 in 0 : vector<4x384xbf16>, vector<4x384xbf16>, vector<4x384xbf16>, vector<4x384xbf16>, vector<4x384xbf16>, vector<4x384xbf16>, vector<4x384xbf16>, vector<4x384xbf16>, vector<4x384xbf16> -> vector<36x384xbf16>
    %c0_2 = arith.constant 0 : index
    %c0_3 = arith.constant 0 : index
    %12 = vector.load %arg2[%c0_2, %c0_3] : memref<8x36xbf16, #tpu.memory_space<vmem>>, vector<8x36xbf16>
    %cst = arith.constant dense<0.000000e+00> : vector<8x384xf32>
    %13 = tpu.matmul %12, %11, %cst {dimension_numbers = #tpu.dot_dimension_numbers<[1], [0], [0], [1], [0, 0, 1, 1], [], []>} : vector<8x36xbf16>, vector<36x384xbf16>, vector<8x384xf32> -> vector<8x384xf32>
    %c0_4 = arith.constant 0 : index
    %c0_5 = arith.constant 0 : index
    %14 = vector.load %arg3[%c0_4, %c0_5] : memref<8x1xf32, #tpu.memory_space<vmem>>, vector<8x1xf32>
    %15 = vector.broadcast %14 : vector<8x1xf32> to vector<8x384xf32>
    %16 = arith.addf %13, %15 : vector<8x384xf32>
    %c0_6 = arith.constant 0 : index
    %c0_7 = arith.constant 0 : index
    %c0_8 = arith.constant 0 : index
    %17 = vector.load %arg4[%c0_6, %c0_7, %c0_8] : memref<1x8x384xf32, #tpu.memory_space<vmem>>, vector<1x8x384xf32>
    %18 = vector.shape_cast %17 : vector<1x8x384xf32> to vector<8x384xf32>
    %19 = vector.shape_cast %16 : vector<8x384xf32> to vector<1x8x384xf32>
    tpu.vector_store %arg4[%c0_6, %c0_7, %c0_8], %19 {strides = array<i32>} : memref<1x8x384xf32, #tpu.memory_space<vmem>>, vector<1x8x384xf32>,
    return
  }
  func.func @transform_0(%arg0: i32) -> (i32, i32, i32) {
    %c0_i32 = arith.constant 0 : i32
    %c0_i32_0 = arith.constant 0 : i32
    %c0_i32_1 = arith.constant 0 : i32
    return %arg0, %c0_i32, %c0_i32_0 : i32, i32, i32
  }
  func.func @transform_1(%arg0: i32) -> (i32, i32) {
    %c0_i32 = arith.constant 0 : i32
    %c0_i32_0 = arith.constant 0 : i32
    %c0_i32_1 = arith.constant 0 : i32
    return %c0_i32, %c0_i32_0 : i32, i32
  }
  func.func @transform_2(%arg0: i32) -> (i32, i32) {
    %c0_i32 = arith.constant 0 : i32
    %c0_i32_0 = arith.constant 0 : i32
    %c0_i32_1 = arith.constant 0 : i32
    return %c0_i32, %c0_i32_0 : i32, i32
  }
  func.func @transform_3(%arg0: i32) -> (i32, i32, i32) {
    %c0_i32 = arith.constant 0 : i32
    %c0_i32_0 = arith.constant 0 : i32
    %c0_i32_1 = arith.constant 0 : i32
    return %arg0, %c0_i32, %c0_i32_0 : i32, i32, i32
  }
}

</mosaic_0001>

<bundles_post_ra>
// kernel: conv2d_wrapper_forward.1
= control target key start
LH: loop header
LB: loop body
LE: loop exit
PB: predicated region body
PF: predicated region fallthrough
CT: control target
= control target key end

     0   :  { %s601_s12 = smov 0   ;;  %s698_s0 = inlined_call_operand.vmem [shape: bf16[2,4,512], index: 0, kind: input, shape index: {}]   ;;  %s699_s1 = inlined_call_operand.vmem [shape: bf16[8,36], index: 1, kind: input, shape index: {}]   ;;  %s700_s2 = inlined_call_operand.vmem [shape: f32[8,1], index: 2, kind: input, shape index: {}]   ;;  %s701_s3 = inlined_call_operand.vmem [shape: f32[2,8,384], index: 3, kind: output, shape index: {}]  }
   0x1 LB: > { %s509_s13 = sadd.s32 4294967295, %s567_s12   ;;  %p513_p0 = scmp.ge.s32.totalorder %s567_s12, 1  ;;  %s567_s12 = sphi %s601_s12, %s13_s12  }
   0x2   : > { %p137_p1 = scmp.lt.s32.totalorder %s567_s12, 3 }
   0x4   : > { %p138_p2 = pnand %p513_p0, %p137_p1 }
   0x5   : > { %p161_p3 = scmp.lt.s32.totalorder (!%p138_p2), %s509_s13, 1  ;;  %s570_s18 = smov (!%p138_p2), 108  }
   0x6   : > { %141 = sbr.rel (%p138_p2) target bundleno = 399 (0x18f), region = 32  ;;  %s571_s19 = smov (!%p138_p2), 90  }
   0x7   : > { %s573_s20 = smov (!%p138_p2), 109   ;;  %s574_s21 = smov (!%p138_p2), 92  }
   0x8   : > { %s575_s22 = smov (!%p138_p2), 91   ;;  %s576_s23 = smov (!%p138_p2), 127  }
   0x9   : > { %s577_s24 = smov (!%p138_p2), 126   ;;  %s580_s25 = smov (!%p138_p2), 110  }
   0xb   : > { %v178_v0 = vlaneseq  ;;  %v569_v1 = vmov 1983009808   ;;  %s703_s13 = smov (!%p161_p3, %s509_s13), 1  ;;  %v572_v12 = vmov 0.0   ;;  %v578_v19 = vmov 0   ;;  %v351_v20 = vld [vmem:[%s700_s2] sm:$0xff] }
   0xc   : > { %v176_v2 = vunpack.c.l.s4 %v569_v1  ;;  %s522_s14 = sshll.u32 %s703_s13, 3  ;;  %527 = vmatprep.subr.bf16.mxu1 %v572_v12  ;;  %402 = vmatprep.mubr.bf16.mxu0 %v578_v19  ;;  %vm579_vm0 = vmmov 0   ;;  %vm295_vm1 = vcmask 736256   ;;  %vm299_vm2 = vcmask 1041408   ;;  %s537_s30 = smul.u32 24, %s703_s13 }
   0xd   : > { %v179_v3 = vshrl.u32 %v178_v0, 7  ;;  %s165_s17 = scalar_lea.vmem %s698_s0, %s522_s14  ;;  %533 = vmatprep.mubr.msk.bf16.mxu1 %vm579_vm0, %v572_v12  ;;  %558 = vset.pattern.permute.xlu0 %v578_v19  ;;  %vm259_vm3 = vcmask 883712   ;;  %vm271_vm4 = vcmask 752640   ;;  %vm247_vm5 = vcmask 891904  }
   0xe   : > { %v177_v4 = vunpack.c.0.s8 %v176_v2  ;;  %v172_v6 = vld [vmem:[%s165_s17] sm:$0xff]  ;;  %vm283_vm6 = vcmask 744448   ;;  %vm309_vm7 = vcmask 1043456   ;;  %vm316_vm8 = vcmask 1045504   ;;  %s170_s6 = scalar_lea.vmem %s701_s3, %s537_s30 }
   0xf   : > { %v174_v8 = vcombine.high %v172_v6, %v172_v6  ;;  %v190_v11 = vcombine.low %v172_v6, %v172_v6  ;;  %vm207_vm9 = vcmask 1039360   ;;  %vm221_vm10 = vcmask 1031168  }
  0x10   : > { %v180_v5 = vsub.s32 %v177_v4, %v179_v3  ;;  %vm234_vm11 = vcmask 900096   ;;  %vm357_vm12 = vcmask 293888  }
  0x12   : > { %v615_v7 = vrot.slane %v172_v6, %v180_v5  ;;  %v623_v10 = vrot.slane %v174_v8, %v180_v5  ;;  %v197_v13 = vrot.slane %v190_v11, %v180_v5 }
  0x14   : > { %255 = vrot.lane.b32.xlu1 %v615_v7, %s570_s18  ;;  %287 = vrot.lane.b32.xlu0 %v615_v7, %s571_s19  ;;  %v621_v9 = vcombine.high %v615_v7, %v615_v7  ;;  %v198_v14 = vcombine.high %v197_v13, %v197_v13  ;;  %v238_v15 = vcombine.high %v623_v10, %v623_v10 }
  0x15   : > { %v212_v16 = vcombine.low %v623_v10, %v623_v10  ;;  %v211_v17 = vcombine.low %v615_v7, %v615_v7  ;;  %v225_v18 = vcombine.low %v197_v13, %v197_v13 }
  0x18   : > { %289 = vrot.lane.b32.xlu0 %v621_v9, %s571_s19  ;;  %291 = vrot.lane.b32.xlu1 %v623_v10, %s571_s19 }
  0x1c   : > { %241 = vrot.lane.b32.xlu0 %v621_v9, %s573_s20  ;;  %243 = vrot.lane.b32.xlu1 %v623_v10, %s573_s20 }
  0x20   : > { %253 = vrot.lane.b32.xlu0 %v198_v14, %s570_s18  ;;  %293 = vrot.lane.b32.xlu1 %v238_v15, %s571_s19 }
  0x24   : > { %239 = vrot.lane.b32.xlu0 %v615_v7, %s573_s20  ;;  %245 = vrot.lane.b32.xlu1 %v238_v15, %s573_s20 }
  0x28   : > { %251 = vrot.lane.b32.xlu0 %v197_v13, %s570_s18  ;;  %257 = vrot.lane.b32.xlu1 %v621_v9, %s570_s18 }
  0x2c   : > { %265 = vrot.lane.b32.xlu0 %v615_v7, %s574_s21  ;;  %267 = vrot.lane.b32.xlu1 %v212_v16, %s574_s21 }
  0x30   : > { %263 = vrot.lane.b32.xlu0 %v211_v17, %s574_s21  ;;  %269 = vrot.lane.b32.xlu1 %v623_v10, %s574_s21 }
  0x34   : > { %277 = vrot.lane.b32.xlu0 %v197_v13, %s575_s22  ;;  %279 = vrot.lane.b32.xlu1 %v211_v17, %s575_s22 }
  0x38   : > { %275 = vrot.lane.b32.xlu0 %v225_v18, %s575_s22  ;;  %281 = vrot.lane.b32.xlu1 %v615_v7, %s575_s22 }
  0x3c   : > { %201 = vrot.lane.b32.xlu0 %v198_v14, %s576_s23  ;;  %203 = vrot.lane.b32.xlu1 %v615_v7, %s576_s23 }
  0x40   : > { %199 = vrot.lane.b32.xlu0 %v197_v13, %s576_s23  ;;  %205 = vrot.lane.b32.xlu1 %v621_v9, %s576_s23 }
  0x44   : > { %215 = vrot.lane.b32.xlu0 %v615_v7, %s577_s24  ;;  %217 = vrot.lane.b32.xlu1 %v212_v16, %s577_s24 }
  0x48   : > { %213 = vrot.lane.b32.xlu0 %v211_v17, %s577_s24  ;;  %219 = vrot.lane.b32.xlu1 %v623_v10, %s577_s24 }
  0x4c   : > { %228 = vrot.lane.b32.xlu0 %v197_v13, %s580_s25  ;;  %230 = vrot.lane.b32.xlu1 %v211_v17, %s580_s25 }
  0x50   : > { %226 = vrot.lane.b32.xlu0 %v225_v18, %s580_s25  ;;  %232 = vrot.lane.b32.xlu1 %v615_v7, %s580_s25 }
  0x54   : > { %354 = vperm.xlu0 %558, %v351_v20  }
  0x86   : > { %v256_v21 = vpop.permute.xlu1 %255  ;;  %v288_v22 = vpop.permute.xlu0 %287 }
  0x8a   : > { %v290_v23 = vpop.permute.xlu0 %289  ;;  %v292_v24 = vpop.permute.xlu1 %291 }
  0x8b   : > { %v297_v25 = vsel %vm295_vm1, %v290_v23, %v292_v24  ;;  %v296_v26 = vsel %vm295_vm1, %v288_v22, %v290_v23 }
  0x8c   : > { %517 = vmatprep.subr.msk.bf16.mxu0 %vm299_vm2, %v297_v25  ;;  %v362_v27 = vsel %vm299_vm2, %v296_v26, 0 }
  0x8d   : > { %381 = vmatpush1.bf16.msra.mxu0 %v362_v27 }
  0x8e   : > { %v242_v28 = vpop.permute.xlu0 %241  ;;  %v244_v29 = vpop.permute.xlu1 %243 }
  0x8f   : > { %v249_v44 = vsel %vm247_vm5, %v242_v28, %v244_v29 }
  0x92   : > { %v254_v30 = vpop.permute.xlu0 %253  ;;  %v294_v31 = vpop.permute.xlu1 %293 }
  0x93   : > { %v298_v32 = vsel %vm295_vm1, %v292_v24, %v294_v31  ;;  %v261_v42 = vsel %vm259_vm3, %v254_v30, %v256_v21 }
  0x94   : > { %v368_v33 = vsel %vm299_vm2, %v298_v32, 0  ;;  %v331_v45 = vsel %vm299_vm2, %v249_v44, %v261_v42 }
  0x95   : > { %528 = vmatpush3.bf16.msra.mxu1 %v368_v33 }
  0x96   : > { %v240_v34 = vpop.permute.xlu0 %239  ;;  %v246_v35 = vpop.permute.xlu1 %245  ;;  %529 = vmatprep.subr.bf16.mxu1 %v572_v12 }
  0x97   : > { %v248_v55 = vsel %vm247_vm5, %v240_v34, %v242_v28  ;;  %v250_v56 = vsel %vm247_vm5, %v244_v29, %v246_v35 }
  0x9a   : > { %v252_v36 = vpop.permute.xlu0 %251  ;;  %v258_v37 = vpop.permute.xlu1 %257 }
  0x9b   : > { %v260_v48 = vsel %vm259_vm3, %v252_v36, %v254_v30  ;;  %v262_v49 = vsel %vm259_vm3, %v256_v21, %v258_v37 }
  0x9c   : > { %v328_v57 = vsel %vm299_vm2, %v248_v55, %v260_v48  ;;  %v334_v58 = vsel %vm299_vm2, %v250_v56, %v262_v49 }
  0x9e   : > { %v266_v38 = vpop.permute.xlu0 %265  ;;  %v268_v39 = vpop.permute.xlu1 %267 }
  0x9f   : > { %v273_v43 = vsel %vm271_vm4, %v266_v38, %v268_v39 }
  0xa0   : > { %v338_v51 = vsel %vm309_vm7, %v331_v45, %v273_v43 }
  0xa2   : > { %v264_v40 = vpop.permute.xlu0 %263  ;;  %v270_v41 = vpop.permute.xlu1 %269 }
  0xa3   : > { %v272_v52 = vsel %vm271_vm4, %v264_v40, %v266_v38  ;;  %v274_v53 = vsel %vm271_vm4, %v268_v39, %v270_v41 }
  0xa4   : > { %v336_v63 = vsel %vm309_vm7, %v328_v57, %v272_v52  ;;  %v340_v0 = vsel %vm309_vm7, %v334_v58, %v274_v53 }
  0xa6   : > { %v278_v46 = vpop.permute.xlu0 %277  ;;  %v280_v47 = vpop.permute.xlu1 %279 }
  0xa7   : > { %v285_v50 = vsel %vm283_vm6, %v278_v46, %v280_v47 }
  0xa8   : > { %v345_v54 = vsel %vm316_vm8, %v338_v51, %v285_v50 }
  0xa9   : > { %382 = vmatprep.subr.bf16.mxu0 %v345_v54 }
  0xaa   : > { %v276_v59 = vpop.permute.xlu0 %275  ;;  %v282_v60 = vpop.permute.xlu1 %281 }
  0xab   : > { %v284_v61 = vsel %vm283_vm6, %v276_v59, %v278_v46  ;;  %v286_v62 = vsel %vm283_vm6, %v280_v47, %v282_v60 }
  0xac   : > { %v342_v1 = vsel %vm316_vm8, %v336_v63, %v284_v61  ;;  %v348_v2 = vsel %vm316_vm8, %v340_v0, %v286_v62 }
  0xad   : > { %383 = vmatpush1.bf16.msra.mxu0 %v342_v1  ;;  %530 = vmatpush3.bf16.msra.mxu1 %v348_v2 }
  0xae   : > { %v202_v3 = vpop.permute.xlu0 %201  ;;  %v204_v4 = vpop.permute.xlu1 %203  ;;  %531 = vmatprep.subr.bf16.mxu1 %v572_v12 }
  0xaf   : > { %v209_v15 = vsel %vm207_vm9, %v202_v3, %v204_v4 }
  0xb0   : > { %v305_v17 = vsel %vm299_vm2, %v621_v9, %v209_v15 }
  0xb2   : > { %v200_v5 = vpop.permute.xlu0 %199  ;;  %v206_v6 = vpop.permute.xlu1 %205 }
  0xb3   : > { %v208_v20 = vsel %vm207_vm9, %v200_v5, %v202_v3  ;;  %v210_v21 = vsel %vm207_vm9, %v204_v4, %v206_v6 }
  0xb4   : > { %v302_v26 = vsel %vm299_vm2, %v615_v7, %v208_v20  ;;  %v308_v9 = vsel %vm299_vm2, %v623_v10, %v210_v21  ;;  %v350_v7 = vld [vmem:[%s699_s1] sm:$0xf] }
  0xb6   : > { %v216_v8 = vpop.permute.xlu0 %215  ;;  %v218_v11 = vpop.permute.xlu1 %217 }
  0xb7   : > { %v223_v16 = vsel %vm221_vm10, %v216_v8, %v218_v11 }
  0xb8   : > { %v313_v22 = vsel %vm309_vm7, %v305_v17, %v223_v16 }
  0xba   : > { %v214_v13 = vpop.permute.xlu0 %213  ;;  %v220_v14 = vpop.permute.xlu1 %219 }
  0xbb   : > { %v222_v23 = vsel %vm221_vm10, %v214_v13, %v216_v8  ;;  %v224_v24 = vsel %vm221_vm10, %v218_v11, %v220_v14 }
  0xbc   : > { %v311_v31 = vsel %vm309_vm7, %v302_v26, %v222_v23  ;;  %v315_v32 = vsel %vm309_vm7, %v308_v9, %v224_v24 }
  0xbe   : > { %v229_v18 = vpop.permute.xlu0 %228  ;;  %v231_v19 = vpop.permute.xlu1 %230 }
  0xbf   : > { %v236_v12 = vsel %vm234_vm11, %v229_v18, %v231_v19 }
  0xc0   : > { %v321_v25 = vsel %vm316_vm8, %v313_v22, %v236_v12 }
  0xc1   : > { %384 = vmatprep.subr.bf16.mxu0 %v321_v25 }
  0xc2   : > { %v227_v27 = vpop.permute.xlu0 %226  ;;  %v233_v28 = vpop.permute.xlu1 %232 }
  0xc3   : > { %v235_v29 = vsel %vm234_vm11, %v227_v27, %v229_v18  ;;  %v237_v30 = vsel %vm234_vm11, %v231_v19, %v233_v28 }
  0xc4   : > { %v318_v33 = vsel %vm316_vm8, %v311_v31, %v235_v29  ;;  %v324_v34 = vsel %vm316_vm8, %v315_v32, %v237_v30 }
  0xc5   : > { %385 = vmatpush1.bf16.msra.mxu0 %v318_v33  ;;  %532 = vmatpush3.bf16.msra.mxu1 %v324_v34 }
  0xc8   : > { %518 = vmatmul.mubr.msk.bf16.vlgmr.msra.gmra.mxu0 %vm357_vm12, %v350_v7  ;;  %534 = vmatmul.mubr.msk.bf16.vlgmr.msra.gmra.mxu1 %vm357_vm12, %v350_v7 }
  0xcf   : > { %v355_v10 = vpop.permute.xlu0 %354 }
 0x188   : > { %v404_v35 = vpop.f32.mrf.mxu0  ;;  %v445_v36 = vpop.f32.mrf.mxu1 }
 0x189   : > { %v405_v37 = vadd.f32 %v404_v35, %v355_v10  ;;  %v446_v38 = vadd.f32 %v445_v36, %v355_v10 }
 0x18a   : > { %v406_v39 = vpop.f32.mrf.mxu0  ;;  %v535_v40 = vpop.f32.mrf.mxu1 }
 0x18b   : > { %451 = vst [vmem:[%s170_s6] sm:$0xff] %v405_v37  ;;  %453 = vst [vmem:[%s170_s6 + $0x10] sm:$0xff] %v446_v38  ;;  %v407_v41 = vadd.f32 %v406_v39, %v355_v10 }
 0x18c   : > { %v408_v42 = vpop.f32.mrf.mxu0  ;;  %v448_v43 = vpop.f32.mrf.mxu1 }
 0x18d   : > { %452 = vst [vmem:[%s170_s6 + $0x8] sm:$0xff] %v407_v41 }
 0x18e   : > { %v409_v44 = vpop.f32.mrf.mxu0  ;;  %v536_v45 = vpop.f32.mrf.mxu1 }
 0x18f PF: > { %s13_s12 = sadd.s32 1, %s567_s12  }
 0x190   : > { %p10_p4 = scmp.ge.s32.totalorder %s13_s12, 4  }
 0x192   :  { %12 = sbr.rel (!%p10_p4) target bundleno = 1 (0x1), region = 62 }

</bundles_post_ra>
